<compile_context>
chip_gen: v7x
topology: tpu7x:2x2x1
jax: 0.10.0
libtpu: 0.0.40
codegen_flags: <defaults>
</compile_context>

<pallas_src>
import jax
import jax.numpy as jnp
from jax.experimental import pallas as pl
from jax.experimental.pallas import tpu as pltpu


# Channel counts at or below this run as VPU broadcast-FMAs; above -> MXU.
# (The VALU slot saturates well before the HBM roofline for larger C_in,
# while even a heavily padded MXU matmul is effectively free.)
_VPU_MAX_CIN = 4


def _make_kernel(c_in, use_vpu):
    """Kernel over one lane tile: x (C_in, TL), w (C_out, C_in), b (C_out, 1)."""

    def kernel(x_ref, w_ref, b_ref, o_ref):
        bias = b_ref[...].astype(jnp.float32)                  # (C_out, 1)
        if use_vpu:
            # Tiny contraction: C_in broadcast-FMAs on the VPU.  x rows are
            # cast per-iteration (no full-slab f32 copy -> half the VMEM/vreg
            # pressure for bf16 inputs, bounded live ranges).
            w = w_ref[...].astype(jnp.float32)                 # (C_out, C_in)
            acc = w[:, 0:1] * x_ref[0:1, :].astype(jnp.float32)
            for c in range(1, c_in):
                acc = acc + w[:, c:c + 1] * x_ref[c:c + 1, :].astype(jnp.float32)
        else:
            # MXU path: native-dtype operands (full bf16 MXU rate), f32
            # accumulation via preferred_element_type — no explicit upcast.
            acc = jnp.dot(w_ref[...], x_ref[...],
                          preferred_element_type=jnp.float32)
        o_ref[...] = (acc + bias).astype(o_ref.dtype)

    return kernel


def _vmem_plan(c_in, c_out, itemsize, n_lanes, other_parallel):
    """Pick (lane_tile, vmem_limit_bytes) from a generation-aware VMEM budget."""
    try:
        cap = int(getattr(pltpu.get_tpu_info(), "vmem_capacity_bytes", 0)) or (64 << 20)
    except Exception:
        cap = 64 << 20                                   # conservative (v7x-class)
    # Block budget: 8 MiB on v7x-class (64 MiB VMEM/TC), 16 MiB on v5e/v6e
    # (128 MiB VMEM) — bigger tiles amortize the ~0.35us/step overhead.
    block_budget = (8 << 20) if cap <= (64 << 20) else (16 << 20)
    # Per lane column: double-buffered in/out tiles (native dtype) plus
    # kernel-internal f32 temporaries (accumulator, per-row casts).
    per_col = 2 * (c_in + c_out) * itemsize + (c_in + c_out) * 4
    max_cols = (block_budget // per_col) // 128 * 128
    # TODO(synk): if even 128 columns exceed the budget (huge C_in + C_out),
    # tile C_out / add a C_in reduction grid axis instead of shrinking lanes.
    max_cols = max(max_cols, 128)
    l128 = -(-n_lanes // 128)                            # 128-lane chunks
    # Keep >= ~4 total grid points (counting the other parallel grid axis) so
    # v7x's second TensorCore has work and the DMA/compute pipeline overlaps.
    want_tiles = min(l128, max(1, -(-4 // max(other_parallel, 1))))
    chunks_per_tile = max(1, -(-l128 // want_tiles))
    lane_tile = min(max_cols, chunks_per_tile * 128)
    vmem_limit = min(cap * 3 // 4, max(32 << 20, 3 * block_budget))
    return lane_tile, int(vmem_limit)


def _call_with_single_buffered_constants(call):
    """Invoke `call(make_const_spec)` with grid-invariant specs using a single
    pipeline buffer (pl.Buffered(1) drops their unused second buffer); fall
    back to default double-buffered BlockSpecs if this JAX rejects it."""

    def buffered_spec(shape, index_map):
        return pl.BlockSpec(shape, index_map,
                            pipeline_mode=pl.Buffered(buffer_count=1))

    try:
        return call(buffered_spec)
    except Exception:
        return call(pl.BlockSpec)


def _linear_channels_3d(x, w, b):
    """Main path (L >= 128): tile the original layout, no HBM transposes."""
    B, C_in, L = x.shape
    C_out = w.shape[0]
    lane_tile, vmem_limit = _vmem_plan(C_in, C_out, jnp.dtype(x.dtype).itemsize, L, B)
    if lane_tile > L:                                    # keep blocks inside the array
        lane_tile = L if L % 128 == 0 else (L // 128) * 128
    num_l = pl.cdiv(L, lane_tile)

    kernel = _make_kernel(C_in, use_vpu=C_in <= _VPU_MAX_CIN)
    w2 = w.astype(x.dtype)                               # matched dtypes into the MXU
    b2 = b.reshape(C_out, 1)

    def call(const_spec):
        return pl.pallas_call(
            kernel,
            out_shape=jax.ShapeDtypeStruct((B, C_out, L), x.dtype),
            grid_spec=pltpu.PrefetchScalarGridSpec(
                num_scalar_prefetch=0,
                grid=(B, num_l),
                in_specs=[
                    pl.BlockSpec((None, C_in, lane_tile),
                                 lambda bi, li: (bi, 0, li)),
                    const_spec((C_out, C_in), lambda bi, li: (0, 0)),
                    const_spec((C_out, 1), lambda bi, li: (0, 0)),
                ],
                out_specs=pl.BlockSpec((None, C_out, lane_tile),
                                       lambda bi, li: (bi, 0, li)),
            ),
            compiler_params=pltpu.CompilerParams(
                dimension_semantics=("parallel", "parallel"),
                vmem_limit_bytes=vmem_limit),
        )(x, w2, b2)

    return _call_with_single_buffered_constants(call)


def _linear_channels_folded(x, w, b):
    """Small-L fallback (L < 128): fold batch into the lane axis so every
    store stays lane-dense ((B, C_in, L) -> (C_in, B*L))."""
    B, C_in, L = x.shape
    C_out = w.shape[0]
    N = B * L
    xf = jnp.transpose(x, (1, 0, 2)).reshape(C_in, N)    # tiny (L < 128), cheap

    lane_tile, vmem_limit = _vmem_plan(C_in, C_out, jnp.dtype(x.dtype).itemsize, N, 1)
    num_t = pl.cdiv(max(N, 1), lane_tile)
    n_pad = num_t * lane_tile
    if n_pad != N:
        xf = jnp.pad(xf, ((0, 0), (0, n_pad - N)))

    kernel = _make_kernel(C_in, use_vpu=C_in <= _VPU_MAX_CIN)
    w2 = w.astype(x.dtype)
    b2 = b.reshape(C_out, 1)

    def call(const_spec):
        return pl.pallas_call(
            kernel,
            out_shape=jax.ShapeDtypeStruct((C_out, n_pad), x.dtype),
            grid_spec=pltpu.PrefetchScalarGridSpec(
                num_scalar_prefetch=0,
                grid=(num_t,),
                in_specs=[
                    pl.BlockSpec((C_in, lane_tile), lambda n: (0, n)),
                    const_spec((C_out, C_in), lambda n: (0, 0)),
                    const_spec((C_out, 1), lambda n: (0, 0)),
                ],
                out_specs=pl.BlockSpec((C_out, lane_tile), lambda n: (0, n)),
            ),
            compiler_params=pltpu.CompilerParams(
                dimension_semantics=("parallel",),
                vmem_limit_bytes=vmem_limit),
        )(xf, w2, b2)

    yf = _call_with_single_buffered_constants(call)
    yf = yf[:, :N].reshape(C_out, B, L)
    return jnp.transpose(yf, (1, 0, 2))


def permute_linear(x, w, b):
    """Permute(nn.Linear): out[b, o, l] = sum_c w[o, c] * x[b, c, l] + b[o]."""
    _, _, L = x.shape
    if L >= 128:
        return _linear_channels_3d(x, w, b)
    return _linear_channels_folded(x, w, b)


if __name__ == "__main__":
    key = jax.random.PRNGKey(0)

    def reference(x, w, b):
        return jnp.einsum("bcl,oc->bol", x.astype(jnp.float32),
                          w.astype(jnp.float32),
                          precision=jax.lax.Precision.HIGHEST
                          ) + b.astype(jnp.float32)[None, :, None]

    def make_inputs(key, B, C_in, L, C_out, dtype):
        k1, k2, k3, key = jax.random.split(key, 4)
        bound = 1.0 / (C_in ** 0.5)
        x = jax.random.normal(k1, (B, C_in, L), dtype=jnp.float32).astype(dtype)
        w = jax.random.uniform(k2, (C_out, C_in), minval=-bound,
                               maxval=bound).astype(dtype)
        b = jax.random.uniform(k3, (C_out,), minval=-bound,
                               maxval=bound).astype(dtype)
        return key, x, w, b

    # Case 1: module's canonical small shapes (B, C_in, L) = (2, 4, 16),
    # C_out = 8 -> small-L folded path, VPU branch.
    key, x, w, b = make_inputs(key, 2, 4, 16, 8, jnp.float32)
    out = jax.block_until_ready(permute_linear(x, w, b))
    assert out.shape == (2, 8, 16)
    assert jnp.allclose(out, reference(x, w, b), atol=1e-5, rtol=1e-5)

    # Case 2: direct no-transpose 3-D path + MXU branch (L >= 128, C_in > 4).
    # Tolerance is loose enough for default-precision f32 MXU decomposition.
    key, x, w, b = make_inputs(key, 2, 16, 256, 8, jnp.float32)
    out = jax.block_until_ready(permute_linear(x, w, b))
    assert out.shape == (2, 8, 256)
    assert jnp.allclose(out, reference(x, w, b), atol=2e-2, rtol=2e-2)

    # Case 3: bf16 operands stay native into the MXU (f32 accumulation).
    key, x, w, b = make_inputs(key, 1, 8, 128, 16, jnp.bfloat16)
    out = jax.block_until_ready(permute_linear(x, w, b))
    assert out.shape == (1, 16, 128)
    assert jnp.allclose(out.astype(jnp.float32), reference(x, w, b),
                        atol=5e-2, rtol=5e-2)

    print("KERNEL_OK")
</pallas_src>

<mosaic_0001>
module attributes {stable_mosaic.version = 11 : i64} {
  func.func @kernel(%arg0: i32, %arg1: memref<4x128xf32, #tpu.memory_space<vmem>>, %arg2: memref<8x4xf32, #tpu.memory_space<vmem>>, %arg3: memref<8x1xf32, #tpu.memory_space<vmem>>, %arg4: memref<8x128xf32, #tpu.memory_space<vmem>>) attributes {dimension_semantics = [#tpu.dimension_semantics<parallel>], iteration_bounds = array<i64: 1>, scalar_prefetch = 0 : i64, scratch_operands = 0 : i64, tpu.core_type = #tpu.core_type<tc>, window_params = [{transform_indices = @transform_0, window_bounds = array<i64: 4, 128>}, {pipeline_mode = #tpu.pipeline_mode<synchronous>, transform_indices = @transform_1, window_bounds = array<i64: 8, 4>}, {pipeline_mode = #tpu.pipeline_mode<synchronous>, transform_indices = @transform_2, window_bounds = array<i64: 8, 1>}, {transform_indices = @transform_3, window_bounds = array<i64: 8, 128>}]} {
    %c0 = arith.constant 0 : index
    %c0_0 = arith.constant 0 : index
    %0 = vector.load %arg3[%c0, %c0_0] : memref<8x1xf32, #tpu.memory_space<vmem>>, vector<8x1xf32>
    %c0_1 = arith.constant 0 : index
    %c0_2 = arith.constant 0 : index
    %1 = vector.load %arg2[%c0_1, %c0_2] : memref<8x4xf32, #tpu.memory_space<vmem>>, vector<8x4xf32>
    %2 = vector.extract_strided_slice %1 {offsets = [0, 0], sizes = [8, 1], strides = [1, 1]} : vector<8x4xf32> to vector<8x1xf32>
    %c0_3 = arith.constant 0 : index
    %c0_4 = arith.constant 0 : index
    %3 = vector.load %arg1[%c0_3, %c0_4] : memref<4x128xf32, #tpu.memory_space<vmem>>, vector<1x128xf32>
    %4 = vector.broadcast %2 : vector<8x1xf32> to vector<8x128xf32>
    %5 = vector.broadcast %3 : vector<1x128xf32> to vector<8x128xf32>
    %6 = arith.mulf %4, %5 : vector<8x128xf32>
    %7 = vector.extract_strided_slice %1 {offsets = [0, 1], sizes = [8, 1], strides = [1, 1]} : vector<8x4xf32> to vector<8x1xf32>
    %c1 = arith.constant 1 : index
    %c0_5 = arith.constant 0 : index
    %8 = vector.load %arg1[%c1, %c0_5] : memref<4x128xf32, #tpu.memory_space<vmem>>, vector<1x128xf32>
    %9 = vector.broadcast %7 : vector<8x1xf32> to vector<8x128xf32>
    %10 = vector.broadcast %8 : vector<1x128xf32> to vector<8x128xf32>
    %11 = arith.mulf %9, %10 : vector<8x128xf32>
    %12 = arith.addf %6, %11 : vector<8x128xf32>
    %13 = vector.extract_strided_slice %1 {offsets = [0, 2], sizes = [8, 1], strides = [1, 1]} : vector<8x4xf32> to vector<8x1xf32>
    %c2 = arith.constant 2 : index
    %c0_6 = arith.constant 0 : index
    %14 = vector.load %arg1[%c2, %c0_6] : memref<4x128xf32, #tpu.memory_space<vmem>>, vector<1x128xf32>
    %15 = vector.broadcast %13 : vector<8x1xf32> to vector<8x128xf32>
    %16 = vector.broadcast %14 : vector<1x128xf32> to vector<8x128xf32>
    %17 = arith.mulf %15, %16 : vector<8x128xf32>
    %18 = arith.addf %12, %17 : vector<8x128xf32>
    %19 = vector.extract_strided_slice %1 {offsets = [0, 3], sizes = [8, 1], strides = [1, 1]} : vector<8x4xf32> to vector<8x1xf32>
    %c3 = arith.constant 3 : index
    %c0_7 = arith.constant 0 : index
    %20 = vector.load %arg1[%c3, %c0_7] : memref<4x128xf32, #tpu.memory_space<vmem>>, vector<1x128xf32>
    %21 = vector.broadcast %19 : vector<8x1xf32> to vector<8x128xf32>
    %22 = vector.broadcast %20 : vector<1x128xf32> to vector<8x128xf32>
    %23 = arith.mulf %21, %22 : vector<8x128xf32>
    %24 = arith.addf %18, %23 : vector<8x128xf32>
    %25 = vector.broadcast %0 : vector<8x1xf32> to vector<8x128xf32>
    %26 = arith.addf %24, %25 : vector<8x128xf32>
    %c0_8 = arith.constant 0 : index
    %c0_9 = arith.constant 0 : index
    %27 = vector.load %arg4[%c0_8, %c0_9] : memref<8x128xf32, #tpu.memory_space<vmem>>, vector<8x128xf32>
    tpu.vector_store %arg4[%c0_8, %c0_9], %26 {strides = array<i32>} : memref<8x128xf32, #tpu.memory_space<vmem>>, vector<8x128xf32>,
    return
  }
  func.func @transform_0(%arg0: i32) -> (i32, i32) {
    %c0_i32 = arith.constant 0 : i32
    %c0_i32_0 = arith.constant 0 : i32
    return %c0_i32, %arg0 : i32, i32
  }
  func.func @transform_1(%arg0: i32) -> (i32, i32) {
    %c0_i32 = arith.constant 0 : i32
    %c0_i32_0 = arith.constant 0 : i32
    %c0_i32_1 = arith.constant 0 : i32
    return %c0_i32, %c0_i32_0 : i32, i32
  }
  func.func @transform_2(%arg0: i32) -> (i32, i32) {
    %c0_i32 = arith.constant 0 : i32
    %c0_i32_0 = arith.constant 0 : i32
    %c0_i32_1 = arith.constant 0 : i32
    return %c0_i32, %c0_i32_0 : i32, i32
  }
  func.func @transform_3(%arg0: i32) -> (i32, i32) {
    %c0_i32 = arith.constant 0 : i32
    %c0_i32_0 = arith.constant 0 : i32
    return %c0_i32, %arg0 : i32, i32
  }
}

module attributes {stable_mosaic.version = 11 : i64} {
  func.func @kernel(%arg0: i32, %arg1: memref<4x128xf32, #tpu.memory_space<vmem>>, %arg2: memref<8x4xf32, #tpu.memory_space<vmem>>, %arg3: memref<8x1xf32, #tpu.memory_space<vmem>>, %arg4: memref<8x128xf32, #tpu.memory_space<vmem>>) attributes {dimension_semantics = [#tpu.dimension_semantics<parallel>], iteration_bounds = array<i64: 1>, scalar_prefetch = 0 : i64, scratch_operands = 0 : i64, tpu.core_type = #tpu.core_type<tc>, window_params = [{transform_indices = @transform_0, window_bounds = array<i64: 4, 128>}, {pipeline_mode = #tpu.pipeline_mode<synchronous>, transform_indices = @transform_1, window_bounds = array<i64: 8, 4>}, {pipeline_mode = #tpu.pipeline_mode<synchronous>, transform_indices = @transform_2, window_bounds = array<i64: 8, 1>}, {transform_indices = @transform_3, window_bounds = array<i64: 8, 128>}]} {
    %c0 = arith.constant 0 : index
    %c0_0 = arith.constant 0 : index
    %0 = vector.load %arg3[%c0, %c0_0] : memref<8x1xf32, #tpu.memory_space<vmem>>, vector<8x1xf32>
    %c0_1 = arith.constant 0 : index
    %c0_2 = arith.constant 0 : index
    %1 = vector.load %arg2[%c0_1, %c0_2] : memref<8x4xf32, #tpu.memory_space<vmem>>, vector<8x4xf32>
    %2 = vector.extract_strided_slice %1 {offsets = [0, 0], sizes = [8, 1], strides = [1, 1]} : vector<8x4xf32> to vector<8x1xf32>
    %c0_3 = arith.constant 0 : index
    %c0_4 = arith.constant 0 : index
    %3 = vector.load %arg1[%c0_3, %c0_4] : memref<4x128xf32, #tpu.memory_space<vmem>>, vector<1x128xf32>
    %4 = vector.broadcast %2 : vector<8x1xf32> to vector<8x128xf32>
    %5 = vector.broadcast %3 : vector<1x128xf32> to vector<8x128xf32>
    %6 = arith.mulf %4, %5 : vector<8x128xf32>
    %7 = vector.extract_strided_slice %1 {offsets = [0, 1], sizes = [8, 1], strides = [1, 1]} : vector<8x4xf32> to vector<8x1xf32>
    %c1 = arith.constant 1 : index
    %c0_5 = arith.constant 0 : index
    %8 = vector.load %arg1[%c1, %c0_5] : memref<4x128xf32, #tpu.memory_space<vmem>>, vector<1x128xf32>
    %9 = vector.broadcast %7 : vector<8x1xf32> to vector<8x128xf32>
    %10 = vector.broadcast %8 : vector<1x128xf32> to vector<8x128xf32>
    %11 = arith.mulf %9, %10 : vector<8x128xf32>
    %12 = arith.addf %6, %11 : vector<8x128xf32>
    %13 = vector.extract_strided_slice %1 {offsets = [0, 2], sizes = [8, 1], strides = [1, 1]} : vector<8x4xf32> to vector<8x1xf32>
    %c2 = arith.constant 2 : index
    %c0_6 = arith.constant 0 : index
    %14 = vector.load %arg1[%c2, %c0_6] : memref<4x128xf32, #tpu.memory_space<vmem>>, vector<1x128xf32>
    %15 = vector.broadcast %13 : vector<8x1xf32> to vector<8x128xf32>
    %16 = vector.broadcast %14 : vector<1x128xf32> to vector<8x128xf32>
    %17 = arith.mulf %15, %16 : vector<8x128xf32>
    %18 = arith.addf %12, %17 : vector<8x128xf32>
    %19 = vector.extract_strided_slice %1 {offsets = [0, 3], sizes = [8, 1], strides = [1, 1]} : vector<8x4xf32> to vector<8x1xf32>
    %c3 = arith.constant 3 : index
    %c0_7 = arith.constant 0 : index
    %20 = vector.load %arg1[%c3, %c0_7] : memref<4x128xf32, #tpu.memory_space<vmem>>, vector<1x128xf32>
    %21 = vector.broadcast %19 : vector<8x1xf32> to vector<8x128xf32>
    %22 = vector.broadcast %20 : vector<1x128xf32> to vector<8x128xf32>
    %23 = arith.mulf %21, %22 : vector<8x128xf32>
    %24 = arith.addf %18, %23 : vector<8x128xf32>
    %25 = vector.broadcast %0 : vector<8x1xf32> to vector<8x128xf32>
    %26 = arith.addf %24, %25 : vector<8x128xf32>
    %c0_8 = arith.constant 0 : index
    %c0_9 = arith.constant 0 : index
    %27 = vector.load %arg4[%c0_8, %c0_9] : memref<8x128xf32, #tpu.memory_space<vmem>>, vector<8x128xf32>
    tpu.vector_store %arg4[%c0_8, %c0_9], %26 {strides = array<i32>} : memref<8x128xf32, #tpu.memory_space<vmem>>, vector<8x128xf32>,
    return
  }
  func.func @transform_0(%arg0: i32) -> (i32, i32) {
    %c0_i32 = arith.constant 0 : i32
    %c0_i32_0 = arith.constant 0 : i32
    return %c0_i32, %arg0 : i32, i32
  }
  func.func @transform_1(%arg0: i32) -> (i32, i32) {
    %c0_i32 = arith.constant 0 : i32
    %c0_i32_0 = arith.constant 0 : i32
    %c0_i32_1 = arith.constant 0 : i32
    return %c0_i32, %c0_i32_0 : i32, i32
  }
  func.func @transform_2(%arg0: i32) -> (i32, i32) {
    %c0_i32 = arith.constant 0 : i32
    %c0_i32_0 = arith.constant 0 : i32
    %c0_i32_1 = arith.constant 0 : i32
    return %c0_i32, %c0_i32_0 : i32, i32
  }
  func.func @transform_3(%arg0: i32) -> (i32, i32) {
    %c0_i32 = arith.constant 0 : i32
    %c0_i32_0 = arith.constant 0 : i32
    return %c0_i32, %arg0 : i32, i32
  }
}

</mosaic_0001>

<bundles_post_ra>
// kernel: tpu_custom_call.1
= control target key start
LH: loop header
LB: loop body
LE: loop exit
PB: predicated region body
PF: predicated region fallthrough
CT: control target
= control target key end

     0   :  { %v121_v1 = vmov 0   ;;  %v122_v2 = vmov 2   ;;  %s176_s0 = inlined_call_operand.vmem [shape: f32[4,128], index: 0, kind: input, shape index: {}]   ;;  %s177_s1 = inlined_call_operand.vmem [shape: f32[8,4], index: 1, kind: input, shape index: {}]   ;;  %s178_s2 = inlined_call_operand.vmem [shape: f32[8,1], index: 2, kind: input, shape index: {}]   ;;  %s179_s3 = inlined_call_operand.hbm [shape: f32[8,128], index: 3, kind: output, shape index: {}]  }
   0x1   :  { %v16_v0 = vld [vmem:[%s177_s1] sm:$0xff]  ;;  %91 = vset.pattern.permute.xlu0 %v121_v1  ;;  %93 = vset.pattern.permute.xlu1 %v122_v2 }
   0x2   :  { %8 = vsyncpa [#allocation3], 0  ;;  %20 = vperm.xlu0 %91, %v16_v0   ;;  %41 = vperm.xlu1 %93, %v16_v0   ;;  %v123_v3 = vmov 1   ;;  %v124_v4 = vmov 3   ;;  %v15_v5 = vld [vmem:[%s178_s2] sm:$0xff]  ;;  %s125_s22 = smov [#allocation2]  }
   0x3   :  { %v82_v8 = vld [vmem:[%s176_s0] ss:$0 sm:$0xff]  ;;  %v83_v9 = vld [vmem:[%s176_s0 + $0x1] ss:$0 sm:$0xff]  ;;  %v84_v10 = vld [vmem:[%s176_s0 + $0x2] ss:$0 sm:$0xff] }
   0x4   :  { %v85_v12 = vld [vmem:[%s176_s0 + $0x3] ss:$0 sm:$0xff]  ;;  %s74_s23 = sshll.u32 %s125_s22, 4  ;;  %s75_s23 = int_to_ptr.vmem [resolvable:$true] %s74_s23 }
   0x5   :  { %s97_s24 = scalar_lea.vmem %s75_s23, 128  ;;  %p102_p1 = scmp.lt.s32.totalorder %s75_s23, %s75_s23 }
   0x6   :  { %92 = vset.pattern.permute.xlu0 %v123_v3  ;;  %94 = vset.pattern.permute.xlu1 %v124_v4  ;;  %p98_p0 = scmp.ne.s32.totalorder %s75_s23, %s97_s24  ;;  %p103_p2 = scmp.lt.s32.totalorder %s97_s24, %s97_s24 }
   0x7   :  { %30 = vperm.xlu0 %92, %v16_v0   ;;  %52 = vperm.xlu1 %94, %v16_v0  }
   0x8   :  { %p104_p3 = por %p103_p2, %p102_p1 }
   0xa   :  { %p105_p4 = pnand %p104_p3, %p98_p0 }
   0xb   :  { %95 = vset.pattern.permute.xlu1 %v121_v1  ;;  %96 = vset.pattern.permute.xlu0 %v121_v1 }
   0xc   :  { %63 = vperm.xlu1 %95, %v15_v5  }
  0x81   :  { %v21_v6 = vpop.permute.xlu0 %20  ;;  %v42_v7 = vpop.permute.xlu1 %41 }
  0x82   :  { %v27_v14 = vmul.f32 %v82_v8, %v21_v6  ;;  %v48_v16 = vmul.f32 %v84_v10, %v42_v7 }
  0x86   :  { %v31_v11 = vpop.permute.xlu0 %30  ;;  %v53_v13 = vpop.permute.xlu1 %52 }
  0x87   :  { %v37_v15 = vmul.f32 %v83_v9, %v31_v11  ;;  %v59_v18 = vmul.f32 %v85_v12, %v53_v13 }
  0x89   :  { %v38_v17 = vadd.f32 %v37_v15, %v27_v14 }
  0x8b   :  { %v49_v19 = vadd.f32 %v48_v16, %v38_v17  ;;  %v64_v20 = vpop.permute.xlu1 %63 }
  0x8d   :  { %v60_v21 = vadd.f32 %v59_v18, %v49_v19 }
  0x8f   :  { %v66_v22 = vadd.f32 %v64_v20, %v60_v21 }
  0x91   :  { %67 = vst [vmem:[#allocation2] sm:$0xff] %v66_v22 }
  0x92   :  { %108 = shalt.err (!%p105_p4)
}
  0x93   :  { %s109_s26 = scalar_lea.hbm %s179_s3, 128 }
  0x94   :  { %p110_p5 = scmp.ne.s32.totalorder %s179_s3, %s109_s26  ;;  %p113_p6 = scmp.lt.u32.totalorder %s109_s26, %s179_s3 }
  0x96   :  { %p115_p7 = pnand %p113_p6, %p110_p5 }
  0x98   :  { %118 = shalt.err (!%p115_p7)
}
  0x99   :  { %77 = dma.vmem_to_hbm [thread:$0]  %s75_s23, 128, %s179_s3, [#allocation3]  }
  0x9a   :  { %119 = dma.done.wait [#allocation3], 128  }
  0x9b   :  { %120 = vsyncadd [#allocation3], 4294967168 }
  0x9c   :  { %81 = vsyncpa [#allocation3], 1 }

// kernel: tpu_custom_call.1
= control target key start
LH: loop header
LB: loop body
LE: loop exit
PB: predicated region body
PF: predicated region fallthrough
CT: control target
= control target key end

     0   :  { %v121_v1 = vmov 0   ;;  %v122_v2 = vmov 2   ;;  %s176_s0 = inlined_call_operand.vmem [shape: f32[4,128], index: 0, kind: input, shape index: {}]   ;;  %s177_s1 = inlined_call_operand.vmem [shape: f32[8,4], index: 1, kind: input, shape index: {}]   ;;  %s178_s2 = inlined_call_operand.vmem [shape: f32[8,1], index: 2, kind: input, shape index: {}]   ;;  %s179_s3 = inlined_call_operand.hbm [shape: f32[8,128], index: 3, kind: output, shape index: {}]  }
   0x1   :  { %v16_v0 = vld [vmem:[%s177_s1] sm:$0xff]  ;;  %91 = vset.pattern.permute.xlu0 %v121_v1  ;;  %93 = vset.pattern.permute.xlu1 %v122_v2 }
   0x2   :  { %8 = vsyncpa [#allocation3], 0  ;;  %20 = vperm.xlu0 %91, %v16_v0   ;;  %41 = vperm.xlu1 %93, %v16_v0   ;;  %v123_v3 = vmov 1   ;;  %v124_v4 = vmov 3   ;;  %v15_v5 = vld [vmem:[%s178_s2] sm:$0xff]  ;;  %s125_s22 = smov [#allocation2]  }
   0x3   :  { %v82_v8 = vld [vmem:[%s176_s0] ss:$0 sm:$0xff]  ;;  %v83_v9 = vld [vmem:[%s176_s0 + $0x1] ss:$0 sm:$0xff]  ;;  %v84_v10 = vld [vmem:[%s176_s0 + $0x2] ss:$0 sm:$0xff] }
   0x4   :  { %v85_v12 = vld [vmem:[%s176_s0 + $0x3] ss:$0 sm:$0xff]  ;;  %s74_s23 = sshll.u32 %s125_s22, 4  ;;  %s75_s23 = int_to_ptr.vmem [resolvable:$true] %s74_s23 }
   0x5   :  { %s97_s24 = scalar_lea.vmem %s75_s23, 128  ;;  %p102_p1 = scmp.lt.s32.totalorder %s75_s23, %s75_s23 }
   0x6   :  { %92 = vset.pattern.permute.xlu0 %v123_v3  ;;  %94 = vset.pattern.permute.xlu1 %v124_v4  ;;  %p98_p0 = scmp.ne.s32.totalorder %s75_s23, %s97_s24  ;;  %p103_p2 = scmp.lt.s32.totalorder %s97_s24, %s97_s24 }
   0x7   :  { %30 = vperm.xlu0 %92, %v16_v0   ;;  %52 = vperm.xlu1 %94, %v16_v0  }
   0x8   :  { %p104_p3 = por %p103_p2, %p102_p1 }
   0xa   :  { %p105_p4 = pnand %p104_p3, %p98_p0 }
   0xb   :  { %95 = vset.pattern.permute.xlu1 %v121_v1  ;;  %96 = vset.pattern.permute.xlu0 %v121_v1 }
   0xc   :  { %63 = vperm.xlu1 %95, %v15_v5  }
  0x81   :  { %v21_v6 = vpop.permute.xlu0 %20  ;;  %v42_v7 = vpop.permute.xlu1 %41 }
  0x82   :  { %v27_v14 = vmul.f32 %v82_v8, %v21_v6  ;;  %v48_v16 = vmul.f32 %v84_v10, %v42_v7 }
  0x86   :  { %v31_v11 = vpop.permute.xlu0 %30  ;;  %v53_v13 = vpop.permute.xlu1 %52 }
  0x87   :  { %v37_v15 = vmul.f32 %v83_v9, %v31_v11  ;;  %v59_v18 = vmul.f32 %v85_v12, %v53_v13 }
  0x89   :  { %v38_v17 = vadd.f32 %v37_v15, %v27_v14 }
  0x8b   :  { %v49_v19 = vadd.f32 %v48_v16, %v38_v17  ;;  %v64_v20 = vpop.permute.xlu1 %63 }
  0x8d   :  { %v60_v21 = vadd.f32 %v59_v18, %v49_v19 }
  0x8f   :  { %v66_v22 = vadd.f32 %v64_v20, %v60_v21 }
  0x91   :  { %67 = vst [vmem:[#allocation2] sm:$0xff] %v66_v22 }
  0x92   :  { %108 = shalt.err (!%p105_p4)
}
  0x93   :  { %s109_s26 = scalar_lea.hbm %s179_s3, 128 }
  0x94   :  { %p110_p5 = scmp.ne.s32.totalorder %s179_s3, %s109_s26  ;;  %p113_p6 = scmp.lt.u32.totalorder %s109_s26, %s179_s3 }
  0x96   :  { %p115_p7 = pnand %p113_p6, %p110_p5 }
  0x98   :  { %118 = shalt.err (!%p115_p7)
}
  0x99   :  { %77 = dma.vmem_to_hbm [thread:$0]  %s75_s23, 128, %s179_s3, [#allocation3]  }
  0x9a   :  { %119 = dma.done.wait [#allocation3], 128  }
  0x9b   :  { %120 = vsyncadd [#allocation3], 4294967168 }
  0x9c   :  { %81 = vsyncpa [#allocation3], 1 }

</bundles_post_ra>
